<compile_context>
chip_gen: v6e
topology: v6e:2x2x1
jax: 0.10.0
libtpu: 0.0.40
codegen_flags: <defaults>
</compile_context>

<pallas_src>
import functools

import jax
import jax.numpy as jnp
from jax.experimental import pallas as pl
from jax.experimental.pallas import tpu as pltpu

_MiB = 1024 * 1024


def ffn_kernel(x_ref, w_up_ref, w_gate_ref, w_down_ref, o_ref,
               u_scratch, acc_scratch, *, n_tiles):
    # x_ref:      (tm, H)          w_up_ref:   (H, tn)
    # w_gate_ref: (I, tn)          w_down_ref: (tn, H)
    # o_ref:      (tm, H)
    # u_scratch:  (tm, I)   compute/weight dtype, persists across the s-sweep
    # acc_scratch:(tm, H)   fp32 down-projection accumulator
    s = pl.program_id(1)
    tn = w_up_ref.shape[1]

    # ---- phase 0: up-projection, one I-tile per grid step --------------------
    @pl.when(s < n_tiles)
    def _up_phase():
        u = jnp.dot(x_ref[...], w_up_ref[...],
                    preferred_element_type=jnp.float32)
        # Store in the weight/compute dtype so the phase-1 matmuls get
        # full-rate (e.g. bf16) MXU inputs instead of fp32.
        if n_tiles == 1:
            u_scratch[...] = u.astype(u_scratch.dtype)
        else:
            off = pl.multiple_of(s * tn, tn)       # 128-aligned (tn % 128 == 0)
            u_scratch[:, pl.ds(off, tn)] = u.astype(u_scratch.dtype)

    # ---- phase 1: gate + SwiGLU + down-projection accumulation ---------------
    @pl.when(s >= n_tiles)
    def _down_phase():
        n = s - n_tiles

        # Single K=I gate matmul (replaces the unrolled per-tile reduction):
        # (tm, I) @ (I, tn) -> (tm, tn), accumulation stays inside the MXU.
        g = jnp.dot(u_scratch[...], w_gate_ref[...],
                    preferred_element_type=jnp.float32)

        if n_tiles == 1:
            u_n = u_scratch[...].astype(jnp.float32)
        else:
            off = pl.multiple_of(n * tn, tn)
            u_n = u_scratch[:, pl.ds(off, tn)].astype(jnp.float32)

        act = (g * jax.nn.sigmoid(g)) * u_n        # silu(W_g u) * u

        # Cast back to the weight dtype for a full-rate MXU down-projection,
        # accumulate in fp32.
        dp = jnp.dot(act.astype(w_down_ref.dtype), w_down_ref[...],
                     preferred_element_type=jnp.float32)      # (tm, H)

        if n_tiles == 1:
            # Single I tile: write straight to the output, no accumulator pass.
            o_ref[...] = dp.astype(o_ref.dtype)
        else:
            @pl.when(n == 0)
            def _first():
                acc_scratch[...] = dp

            @pl.when(jnp.logical_and(n > 0, n < n_tiles - 1))
            def _middle():
                acc_scratch[...] += dp

            @pl.when(n == n_tiles - 1)
            def _last():
                # Fold the final accumulation directly into o_ref: saves one
                # tm*H fp32 store + load + cast pass per row tile.
                o_ref[...] = (acc_scratch[...] + dp).astype(o_ref.dtype)


def _tpu_defaults():
    """Pick (block_m, block_i, vmem_limit_bytes, two_core) per TPU generation."""
    vmem = None
    try:
        info = pltpu.get_tpu_info()
        vmem = getattr(info, "vmem_capacity_bytes", None)
    except Exception:
        vmem = None
    if vmem is not None and vmem <= 72 * _MiB:
        # v7x-like: 64 MiB / TensorCore, 2 TCs per chip.  ~41 MiB footprint at
        # (256, 256) for H=4096 / I=14336 bf16; leave headroom for internal scratch.
        return 256, 256, 52 * _MiB, True
    if vmem is not None and vmem >= 100 * _MiB:
        # v5e / v6e: 128 MiB VMEM.  Bigger row tile pushes the kernel above the
        # HBM/MXU crossover (weights are re-streamed once per row tile).
        return 512, 512, 100 * _MiB, False
    # Unknown backend: conservative settings that fit every generation.
    return 256, 256, 48 * _MiB, False


def myllm_ffn(x, w_up, w_gate, w_down, *, block_m=None, block_i=None,
              vmem_limit_bytes=None):
    """SwiGLU FFN: x [B,S,H]; w_up [H,I]; w_gate [I,I]; w_down [I,H] -> [B,S,H].

    Weights are [in_features, out_features] (transposed from nn.Linear storage).
    For production, pass x/weights in bf16 so the staged u / MXU inputs are not
    silently fp32.
    """
    B, S, H = x.shape
    I = w_up.shape[1]
    assert w_up.shape == (H, I)
    assert w_gate.shape == (I, I)
    assert w_down.shape == (I, H)
    M = B * S
    x2 = x.reshape(M, H)

    d_bm, d_bi, d_vmem, two_core = _tpu_defaults()
    if block_m is None:
        block_m = d_bm
    if block_i is None:
        block_i = d_bi
    if vmem_limit_bytes is None:
        vmem_limit_bytes = d_vmem

    tm = min(block_m, M)
    tn = min(block_i, I)

    # v7x has 2 TensorCores per chip: make sure the "parallel" row axis has at
    # least 2 tiles so both cores get work (decode-sized M otherwise idles one).
    if two_core and tm == M and M >= 16 and (M // 2) % 8 == 0:
        tm = M // 2

    # TODO(synk): no padding/masking path; ragged M or I must be padded by the caller.
    assert M % tm == 0, "rows (batch*seq) must divide the row tile"
    assert I % tn == 0, "intermediate size must divide the I tile"
    assert tm == M or tm % 8 == 0, "row tile must be a multiple of 8 (sublane)"
    assert tn == I or tn % 128 == 0, "I tile must be a multiple of 128 (lane)"

    n_tiles = I // tn
    compute_dtype = w_gate.dtype
    grid = (M // tm, 2 * n_tiles)

    # Clamped index maps: a weight's block index is held constant during the
    # phase that does not use it, so Pallas skips the redundant DMA.
    def x_idx(i, s):
        return (i, 0)

    def up_idx(i, s):
        return (0, jnp.minimum(s, n_tiles - 1))

    def gate_idx(i, s):
        return (0, jnp.maximum(s - n_tiles, 0))

    def down_idx(i, s):
        return (jnp.maximum(s - n_tiles, 0), 0)

    def o_idx(i, s):
        return (i, 0)

    def nbytes(a):
        return a.size * a.dtype.itemsize

    num_row_tiles = M // tm
    weight_bytes = nbytes(w_up) + nbytes(w_gate) + nbytes(w_down)
    cost = pl.CostEstimate(
        flops=2 * M * (H * I + I * I + I * H),
        transcendentals=M * I,
        # Weights are re-fetched once per row tile.
        bytes_accessed=nbytes(x2) + num_row_tiles * weight_bytes
        + M * H * x.dtype.itemsize,
    )

    out2 = pl.pallas_call(
        functools.partial(ffn_kernel, n_tiles=n_tiles),
        out_shape=jax.ShapeDtypeStruct((M, H), x.dtype),
        grid_spec=pltpu.PrefetchScalarGridSpec(
            num_scalar_prefetch=0,
            grid=grid,
            in_specs=[
                pl.BlockSpec((tm, H), x_idx),     # x rows (resident per row tile)
                pl.BlockSpec((H, tn), up_idx),    # W_up column tile   (streamed)
                pl.BlockSpec((I, tn), gate_idx),  # W_gate column tile (streamed)
                pl.BlockSpec((tn, H), down_idx),  # W_down row tile    (streamed)
            ],
            out_specs=pl.BlockSpec((tm, H), o_idx),
            scratch_shapes=[
                pltpu.VMEM((tm, I), compute_dtype),  # staged u = x @ W_up (flat slab)
                pltpu.VMEM((tm, H), jnp.float32),    # down-proj accumulator
            ],
        ),
        compiler_params=pltpu.CompilerParams(
            dimension_semantics=("parallel", "arbitrary"),
            vmem_limit_bytes=vmem_limit_bytes,
        ),
        cost_estimate=cost,
    )(x2, w_up, w_gate, w_down)
    return out2.reshape(B, S, H)


def _init_linear_weight(key, fan_in, fan_out, dtype=jnp.float32):
    # nn.Linear default: U(-1/sqrt(fan_in), 1/sqrt(fan_in)); stored here as [in, out]
    bound = 1.0 / (fan_in ** 0.5)
    return jax.random.uniform(key, (fan_in, fan_out), dtype, -bound, bound)


def _reference(x, w_up, w_gate, w_down):
    u = x @ w_up
    g = u @ w_gate
    a = jax.nn.silu(g) * u
    return a @ w_down


if __name__ == "__main__":
    key = jax.random.PRNGKey(0)

    # ---- test 1: small shapes implied by the forward (single I tile) --------
    B, S, H, I = 2, 8, 32, 64
    kx, ku, kg, kd = jax.random.split(key, 4)
    x = jax.random.normal(kx, (B, S, H), jnp.float32)
    w_up = _init_linear_weight(ku, H, I)      # up: Linear(H -> I), no bias
    w_gate = _init_linear_weight(kg, I, I)    # MyLLMSwiGLU gate: Linear(I -> I), no bias
    w_down = _init_linear_weight(kd, I, H)    # down: Linear(I -> H), no bias

    out = myllm_ffn(x, w_up, w_gate, w_down)
    out = jax.block_until_ready(out)
    ref = _reference(x, w_up, w_gate, w_down)
    assert out.shape == (B, S, H)
    assert jnp.allclose(out, ref, atol=1e-4, rtol=1e-4), "mismatch vs reference (test 1)"

    # ---- test 2: exercise the streamed / multi-I-tile / multi-row-tile path -
    B2, S2, H2, I2 = 2, 8, 128, 256
    k2x, k2u, k2g, k2d = jax.random.split(jax.random.PRNGKey(1), 4)
    x2 = jax.random.normal(k2x, (B2, S2, H2), jnp.float32)
    w_up2 = _init_linear_weight(k2u, H2, I2)
    w_gate2 = _init_linear_weight(k2g, I2, I2)
    w_down2 = _init_linear_weight(k2d, I2, H2)

    out2 = myllm_ffn(x2, w_up2, w_gate2, w_down2, block_m=8, block_i=128)
    out2 = jax.block_until_ready(out2)
    ref2 = _reference(x2, w_up2, w_gate2, w_down2)
    assert out2.shape == (B2, S2, H2)
    assert jnp.allclose(out2, ref2, atol=1e-4, rtol=1e-4), "mismatch vs reference (test 2)"

    # TODO(synk): MyLLMSwiGLU source not provided; assumed gated silu(W_g u) * u
    # (dimension-preserving), the only variant consistent with down's input size.
    print("KERNEL_OK")
</pallas_src>

<mosaic_0001>
module attributes {stable_mosaic.version = 11 : i64} {
  func.func @ffn_kernel(%arg0: i32, %arg1: i32, %arg2: memref<16x32xf32, #tpu.memory_space<vmem>>, %arg3: memref<32x64xf32, #tpu.memory_space<vmem>>, %arg4: memref<64x64xf32, #tpu.memory_space<vmem>>, %arg5: memref<64x32xf32, #tpu.memory_space<vmem>>, %arg6: memref<16x32xf32, #tpu.memory_space<vmem>>, %arg7: memref<16x64xf32, #tpu.memory_space<vmem>>, %arg8: memref<16x32xf32, #tpu.memory_space<vmem>>) attributes {dimension_semantics = [#tpu.dimension_semantics<parallel>, #tpu.dimension_semantics<arbitrary>], iteration_bounds = array<i64: 1, 2>, scalar_prefetch = 0 : i64, scratch_operands = 2 : i64, tpu.core_type = #tpu.core_type<tc>, window_params = [{transform_indices = @transform_0, window_bounds = array<i64: 16, 32>}, {transform_indices = @transform_1, window_bounds = array<i64: 32, 64>}, {transform_indices = @transform_2, window_bounds = array<i64: 64, 64>}, {transform_indices = @transform_3, window_bounds = array<i64: 64, 32>}, {transform_indices = @transform_4, window_bounds = array<i64: 16, 32>}]} {
    %c1_i32 = arith.constant 1 : i32
    %0 = arith.cmpi slt, %arg1, %c1_i32 : i32
    %1 = arith.extui %0 : i1 to i32
    %c0_i32 = arith.constant 0 : i32
    %2 = arith.cmpi ne, %1, %c0_i32 : i32
    scf.if %2 {
      %c0 = arith.constant 0 : index
      %c0_2 = arith.constant 0 : index
      %6 = vector.load %arg2[%c0, %c0_2] : memref<16x32xf32, #tpu.memory_space<vmem>>, vector<16x32xf32>
      %c0_3 = arith.constant 0 : index
      %c0_4 = arith.constant 0 : index
      %7 = vector.load %arg3[%c0_3, %c0_4] : memref<32x64xf32, #tpu.memory_space<vmem>>, vector<32x64xf32>
      %cst = arith.constant dense<0.000000e+00> : vector<16x64xf32>
      %8 = tpu.matmul %6, %7, %cst {dimension_numbers = #tpu.dot_dimension_numbers<[1], [0], [0], [1], [0, 0, 1, 1], [], []>} : vector<16x32xf32>, vector<32x64xf32>, vector<16x64xf32> -> vector<16x64xf32>
      %c0_5 = arith.constant 0 : index
      %c0_6 = arith.constant 0 : index
      %9 = vector.load %arg7[%c0_5, %c0_6] : memref<16x64xf32, #tpu.memory_space<vmem>>, vector<16x64xf32>
      tpu.vector_store %arg7[%c0_5, %c0_6], %8 {strides = array<i32>} : memref<16x64xf32, #tpu.memory_space<vmem>>, vector<16x64xf32>,
    } else {
    }
    %c1_i32_0 = arith.constant 1 : i32
    %3 = arith.cmpi sge, %arg1, %c1_i32_0 : i32
    %4 = arith.extui %3 : i1 to i32
    %c0_i32_1 = arith.constant 0 : i32
    %5 = arith.cmpi ne, %4, %c0_i32_1 : i32
    scf.if %5 {
      %c0 = arith.constant 0 : index
      %c0_2 = arith.constant 0 : index
      %6 = vector.load %arg7[%c0, %c0_2] : memref<16x64xf32, #tpu.memory_space<vmem>>, vector<16x64xf32>
      %c0_3 = arith.constant 0 : index
      %c0_4 = arith.constant 0 : index
      %7 = vector.load %arg4[%c0_3, %c0_4] : memref<64x64xf32, #tpu.memory_space<vmem>>, vector<64x64xf32>
      %cst = arith.constant dense<0.000000e+00> : vector<16x64xf32>
      %8 = tpu.matmul %6, %7, %cst {dimension_numbers = #tpu.dot_dimension_numbers<[1], [0], [0], [1], [0, 0, 1, 1], [], []>} : vector<16x64xf32>, vector<64x64xf32>, vector<16x64xf32> -> vector<16x64xf32>
      %c0_5 = arith.constant 0 : index
      %c0_6 = arith.constant 0 : index
      %9 = vector.load %arg7[%c0_5, %c0_6] : memref<16x64xf32, #tpu.memory_space<vmem>>, vector<16x64xf32>
      %10 = arith.negf %8 : vector<16x64xf32>
      %11 = math.exp %10 : vector<16x64xf32>
      %cst_7 = arith.constant 1.000000e+00 : f32
      %12 = vector.broadcast %cst_7 : f32 to vector<16x64xf32>
      %13 = arith.addf %12, %11 : vector<16x64xf32>
      %14 = arith.divf %12, %13 : vector<16x64xf32>
      %15 = arith.mulf %8, %14 : vector<16x64xf32>
      %16 = arith.mulf %15, %9 : vector<16x64xf32>
      %c0_8 = arith.constant 0 : index
      %c0_9 = arith.constant 0 : index
      %17 = vector.load %arg5[%c0_8, %c0_9] : memref<64x32xf32, #tpu.memory_space<vmem>>, vector<64x32xf32>
      %cst_10 = arith.constant dense<0.000000e+00> : vector<16x32xf32>
      %18 = tpu.matmul %16, %17, %cst_10 {dimension_numbers = #tpu.dot_dimension_numbers<[1], [0], [0], [1], [0, 0, 1, 1], [], []>} : vector<16x64xf32>, vector<64x32xf32>, vector<16x32xf32> -> vector<16x32xf32>
      %c0_11 = arith.constant 0 : index
      %c0_12 = arith.constant 0 : index
      %19 = vector.load %arg6[%c0_11, %c0_12] : memref<16x32xf32, #tpu.memory_space<vmem>>, vector<16x32xf32>
      tpu.vector_store %arg6[%c0_11, %c0_12], %18 {strides = array<i32>} : memref<16x32xf32, #tpu.memory_space<vmem>>, vector<16x32xf32>,
    } else {
    }
    return
  }
  func.func @transform_0(%arg0: i32, %arg1: i32) -> (i32, i32) {
    %c0_i32 = arith.constant 0 : i32
    %c0_i32_0 = arith.constant 0 : i32
    return %arg0, %c0_i32 : i32, i32
  }
  func.func @transform_1(%arg0: i32, %arg1: i32) -> (i32, i32) {
    %c0_i32 = arith.constant 0 : i32
    %0 = arith.minsi %arg1, %c0_i32 : i32
    %c0_i32_0 = arith.constant 0 : i32
    %c0_i32_1 = arith.constant 0 : i32
    return %c0_i32_0, %0 : i32, i32
  }
  func.func @transform_2(%arg0: i32, %arg1: i32) -> (i32, i32) {
    %c1_i32 = arith.constant 1 : i32
    %0 = arith.subi %arg1, %c1_i32 : i32
    %c0_i32 = arith.constant 0 : i32
    %1 = arith.maxsi %0, %c0_i32 : i32
    %c0_i32_0 = arith.constant 0 : i32
    %c0_i32_1 = arith.constant 0 : i32
    return %c0_i32_0, %1 : i32, i32
  }
  func.func @transform_3(%arg0: i32, %arg1: i32) -> (i32, i32) {
    %c1_i32 = arith.constant 1 : i32
    %0 = arith.subi %arg1, %c1_i32 : i32
    %c0_i32 = arith.constant 0 : i32
    %1 = arith.maxsi %0, %c0_i32 : i32
    %c0_i32_0 = arith.constant 0 : i32
    %c0_i32_1 = arith.constant 0 : i32
    return %1, %c0_i32_0 : i32, i32
  }
  func.func @transform_4(%arg0: i32, %arg1: i32) -> (i32, i32) {
    %c0_i32 = arith.constant 0 : i32
    %c0_i32_0 = arith.constant 0 : i32
    return %arg0, %c0_i32 : i32, i32
  }
}

</mosaic_0001>

<bundles_post_ra>
// kernel: tpu_custom_call.1
= control target key start
LH: loop header
LB: loop body
LE: loop exit
PB: predicated region body
PF: predicated region fallthrough
CT: control target
= control target key end

     0   :  { %9 = vsyncpa [#allocation5], 0  ;;  %s1120_s0 = inlined_call_operand.hbm [shape: f32[16,32], index: 0, kind: input, shape index: {}]   ;;  %s1121_s1 = inlined_call_operand.vmem [shape: f32[32,64], index: 1, kind: input, shape index: {}]   ;;  %s1122_s2 = inlined_call_operand.vmem [shape: f32[64,64], index: 2, kind: input, shape index: {}]   ;;  %s1123_s3 = inlined_call_operand.vmem [shape: f32[64,32], index: 3, kind: input, shape index: {}]   ;;  %s1124_s4 = inlined_call_operand.hbm [shape: f32[16,32], index: 4, kind: output, shape index: {}]  }
   0x1   :  { %10 = vsyncpa [#allocation6], 0  ;;  %s997_s15 = smov 0   ;;  %s999_s16 = smov 0  }
   0x2   :  { %s1001_s17 = smov 0  }
   0x3 LB: > { %s717_s18 = sadd.s32 4294967295, %s964_s17   ;;  %s25_s19 = sadd.s32 1, %s960_s16  ;;  %s964_s17 = sphi %s1001_s17, %s16_s17   ;;  %s960_s16 = sphi %s999_s16, %s1129_s16   ;;  %s956_s15 = sphi %s997_s15, %s1128_s15  }
   0x4   : > { %p26_p0 = scmp.ge.s32.totalorder %s25_s19, 2  ;;  %p722_p1 = scmp.ge.s32.totalorder %s964_s17, 1 }
   0x5   : > { %p179_p2 = scmp.lt.s32.totalorder %s964_s17, 3  ;;  %p1024_p4 = scmp.eq.s32.totalorder %s717_s18, 0 }
   0x6   : > { %s1131_s19 = smov (%p26_p0, %s25_s19), 0  ;;  %s966_s22 = smov [#allocation4]  }
   0x7   : > { %p1018_p3 = pnand %p722_p1, %p179_p2  ;;  %s194_s23 = sshll.u32 %s966_s22, 4  ;;  %s195_s23 = int_to_ptr.vmem [resolvable:$true] %s194_s23 }
   0x8   : > { %s895_s24 = scalar_lea.vmem %s195_s23, 256  ;;  %p903_p11 = scmp.lt.s32.totalorder %s195_s23, %s195_s23 }
   0x9   : > { %p838_p5 = pneg %p1018_p3  ;;  %p896_p8 = scmp.ne.s32.totalorder %s195_s23, %s895_s24 }
   0xa   : > { %p904_p12 = scmp.lt.s32.totalorder %s895_s24, %s895_s24 }
   0xb   : > { %p839_p6 = pnand %p1024_p4, %p838_p5 }
   0xc   : > { %p905_p13 = por %p904_p12, %p903_p11 }
   0xd   : > { %p886_p7 = pneg %p839_p6 }
   0xf   : > { %p898_p9 = pnand %p896_p8, %p886_p7 }
  0x11   : > { %p899_p10 = pneg %p898_p9 }
  0x13   : > { %p906_p0 = pnand %p905_p13, %p899_p10 }
  0x15   : > { %909 = shalt.err (!%p906_p0)
}
  0x16   : > { %s967_s25 = smov 128   ;;  %s968_s26 = smov 8  }
  0x17   : > { %841 = dma.hbm_to_vmem [thread:$0]  (!%p839_p6), %s1120_s0, 256, %s195_s23, [#allocation5], %s967_s25, %s967_s25, %s968_s26  }
  0x18   : > { %249 = sbr.rel (%p1018_p3) target bundleno = 714 (0x2ca), region = 36 }
  0x1d   : > { %947 = dma.done.wait (%p1024_p4), [#allocation5], 256  }
  0x1e   : > { %949 = vsyncadd (%p1024_p4), [#allocation5], 4294967040  ;;  %p287_p1 = scmp.lt.s32.totalorder %s956_s15, 0  ;;  %s738_s29 = sadd.s32 4294967295, %s956_s15 }
  0x1f   : > { %p306_p2 = scmp.gt.s32.totalorder %s738_s29, 0  ;;  %p741_p3 = scmp.ge.s32.totalorder %s956_s15, 1 }
  0x20   : > { %s288_s30 = scalar_select %p287_p1, %s956_s15, 0 }
  0x21   : > { %s1133_s29 = smov (!%p306_p2, %s738_s29), 0 }
  0x22   : > { %s1135_s30 = smov (!%p287_p1, %s288_s30), 0  ;;  %s739_s5 = sshll.u32 %s1133_s29, 3 }
  0x23   : > { %s730_s6 = sshll.u32 %s1135_s30, 3  ;;  %p309_p5 = scmp.lt.s32.totalorder %s739_s5, 7 }
  0x24   : > { %s292_s9 = scalar_lea.vmem %s1121_s1, %s730_s6  ;;  %321 = sbr.rel (%p741_p3) target bundleno = 246 (0xf6), region = 44 }
  0x25   : > { %s1137_s5 = smov (!%p309_p5, %s739_s5), 7 }
  0x26   : > { %s740_s10 = sshll.u32 %s1137_s5, 3 }
  0x27   : > { %s1050_s13 = scalar_lea.vmem %s1123_s3, %s740_s10 }
  0x29   : > { %v327_v0 = vld [vmem:[%s292_s9 + $0x18] sm:$0xff]  ;;  %v326_v1 = vld [vmem:[%s292_s9 + $0x10] sm:$0xff]  ;;  %vm328_vm0 = vcmask 261120   ;;  %v325_v3 = vld [vmem:[%s292_s9 + $0x8] sm:$0xff]  ;;  %vm410_vm1 = vcmask 523264  }
  0x2a   : > { %781 = vmatprep.subr.mxu0 %v327_v0  ;;  %v322_v2 = vld [vmem:[#allocation4] sm:$0xff]  ;;  %v324_v4 = vld [vmem:[%s292_s9] sm:$0xff]  ;;  %v323_v5 = vld [vmem:[#allocation4 + $0x8] sm:$0xff] }
  0x2b   : > { %782 = vmatpush3.msra.mxu0 %v327_v0  ;;  %789 = vmatprep.mubr.msk.f32.mxu0 %vm328_vm0, %v322_v2 }
  0x2c   : > { %783 = vmatprep.subr.mxu0 %v326_v1 }
  0x2d   : > { %784 = vmatpush3.msra.mxu0 %v326_v1 }
  0x2e   : > { %785 = vmatprep.subr.mxu0 %v325_v3 }
  0x2f   : > { %786 = vmatpush3.msra.mxu0 %v325_v3 }
  0x30   : > { %787 = vmatprep.subr.mxu0 %v324_v4 }
  0x31   : > { %788 = vmatpush3.msra.mxu0 %v324_v4 }
  0x32   : > { %790 = vmatmul.mubr.msk.f32.vlgmr.msra.gmra.mxu0 %vm328_vm0, %v323_v5 }
  0xf2   : > { %v791_v6 = vpop.f32.mrf.mxu0 }
  0xf3   : > { %412 = vst.msk [vmem:[#allocation2 + $0x8] sm:$0xff] %vm410_vm1, %v791_v6 }
  0xf4   : > { %v401_v7 = vpop.f32.mrf.mxu0 }
  0xf5   : > { %411 = vst.msk [vmem:[#allocation2] sm:$0xff] %vm410_vm1, %v401_v7 }
  0xf6 PF: > { %p744_p4 = scmp.lt.s32.totalorder %s956_s15, 1 }
  0xf8   : > { %416 = sbr.rel (%p744_p4) target bundleno = 698 (0x2ba), region = 48 }
  0xfd   : > { %v426_v8 = vld [vmem:[%s1122_s2 + $0x38] sm:$0xff]  ;;  %v425_v9 = vld [vmem:[%s1122_s2 + $0x30] sm:$0xff]  ;;  %vm427_vm2 = vcmask 523264   ;;  %v424_v10 = vld [vmem:[%s1122_s2 + $0x28] sm:$0xff]  ;;  %vm614_vm3 = vcmask 261120  }
  0xfe   : > { %792 = vmatprep.subr.mxu0 %v426_v8  ;;  %v1063_v11 = vld [vmem:[#allocation2] sm:$0xff]  ;;  %v422_v13 = vld [vmem:[%s1122_s2 + $0x18] sm:$0xff]  ;;  %v421_v14 = vld [vmem:[%s1122_s2 + $0x10] sm:$0xff] }
  0xff   : > { %793 = vmatpush3.msra.mxu0 %v426_v8  ;;  %808 = vmatprep.mubr.msk.f32.mxu0 %vm427_vm2, %v1063_v11  ;;  %v423_v12 = vld [vmem:[%s1122_s2 + $0x20] sm:$0xff]  ;;  %v420_v15 = vld [vmem:[%s1122_s2 + $0x8] sm:$0xff]  ;;  %v532_v18 = vld [vmem:[%s1050_s13 + $0x38] sm:$0xff] }
 0x100   : > { %794 = vmatprep.subr.mxu0 %v425_v9  ;;  %v419_v16 = vld [vmem:[%s1122_s2] sm:$0xff]  ;;  %v418_v17 = vld [vmem:[#allocation2 + $0x8] sm:$0xff]  ;;  %811 = vmatprep.subr.mxu1 %v532_v18  ;;  %v531_v19 = vld [vmem:[%s1050_s13 + $0x30] sm:$0xff] }
 0x101   : > { %795 = vmatpush3.msra.mxu0 %v425_v9  ;;  %812 = vmatpush3.msra.mxu1 %v532_v18  ;;  %v530_v20 = vld [vmem:[%s1050_s13 + $0x28] sm:$0xff]  ;;  %v529_v21 = vld [vmem:[%s1050_s13 + $0x20] sm:$0xff]  ;;  %v528_v22 = vld [vmem:[%s1050_s13 + $0x18] sm:$0xff] }
 0x102   : > { %796 = vmatprep.subr.mxu0 %v424_v10  ;;  %813 = vmatprep.subr.mxu1 %v531_v19  ;;  %v527_v23 = vld [vmem:[%s1050_s13 + $0x10] sm:$0xff]  ;;  %v526_v24 = vld [vmem:[%s1050_s13 + $0x8] sm:$0xff]  ;;  %v525_v25 = vld [vmem:[%s1050_s13] sm:$0xff] }
 0x103   : > { %797 = vmatpush3.msra.mxu0 %v424_v10  ;;  %814 = vmatpush3.msra.mxu1 %v531_v19 }
 0x104   : > { %798 = vmatprep.subr.mxu0 %v423_v12  ;;  %815 = vmatprep.subr.mxu1 %v530_v20 }
 0x105   : > { %799 = vmatpush3.msra.mxu0 %v423_v12  ;;  %816 = vmatpush3.msra.mxu1 %v530_v20 }
 0x106   : > { %800 = vmatprep.subr.mxu0 %v422_v13  ;;  %817 = vmatprep.subr.mxu1 %v529_v21 }
 0x107   : > { %801 = vmatpush3.msra.mxu0 %v422_v13  ;;  %818 = vmatpush3.msra.mxu1 %v529_v21 }
 0x108   : > { %802 = vmatprep.subr.mxu0 %v421_v14  ;;  %819 = vmatprep.subr.mxu1 %v528_v22 }
 0x109   : > { %803 = vmatpush3.msra.mxu0 %v421_v14  ;;  %820 = vmatpush3.msra.mxu1 %v528_v22 }
 0x10a   : > { %804 = vmatprep.subr.mxu0 %v420_v15  ;;  %821 = vmatprep.subr.mxu1 %v527_v23 }
 0x10b   : > { %805 = vmatpush3.msra.mxu0 %v420_v15  ;;  %822 = vmatpush3.msra.mxu1 %v527_v23 }
 0x10c   : > { %806 = vmatprep.subr.mxu0 %v419_v16  ;;  %823 = vmatprep.subr.mxu1 %v526_v24 }
 0x10d   : > { %807 = vmatpush3.msra.mxu0 %v419_v16  ;;  %824 = vmatpush3.msra.mxu1 %v526_v24 }
 0x10e   : > { %809 = vmatmul.mubr.msk.f32.vlgmr.msra.gmra.mxu0 %vm427_vm2, %v418_v17  ;;  %825 = vmatprep.subr.mxu1 %v525_v25 }
 0x10f   : > { %826 = vmatpush3.msra.mxu1 %v525_v25 }
 0x1ce   : > { %v810_v26 = vpop.f32.mrf.mxu0 }
 0x1cf   : > { %v748_v27 = vmul.f32 -1.442695, %v810_v26 }
 0x1d0   : > { %v500_v28 = vpop.f32.mrf.mxu0 }
 0x1d1   : > { %876 = vpow2.f32 %v748_v27  ;;  %v747_v29 = vmul.f32 -1.442695, %v500_v28 }
 0x1d3   : > { %878 = vpow2.f32 %v747_v29 }
 0x1de   : > { %v877_v30 = vpop.eup %876 }
 0x1df   : > { %v516_v31 = vadd.f32 1.0, %v877_v30 }
 0x1e0   : > { %v879_v32 = vpop.eup %878 }
 0x1e1   : > { %880 = vrcp.f32 %v516_v31  ;;  %v515_v33 = vadd.f32 1.0, %v879_v32 }
 0x1e3   : > { %882 = vrcp.f32 %v515_v33 }
 0x1ee   : > { %v881_v34 = vpop.eup %880 }
 0x1ef   : > { %v522_v36 = vmul.f32 %v881_v34, %v810_v26 }
 0x1f0   : > { %v883_v35 = vpop.eup %882 }
 0x1f1   : > { %v521_v37 = vmul.f32 %v883_v35, %v500_v28  ;;  %v524_v39 = vmul.f32 %v522_v36, %v418_v17 }
 0x1f3   : > { %v523_v38 = vmul.f32 %v521_v37, %v1063_v11 }
 0x1f5   : > { %827 = vmatprep.mubr.msk.f32.mxu1 %vm427_vm2, %v523_v38 }
 0x1f6   : > { %828 = vmatmul.mubr.msk.f32.vlgmr.msra.gmra.mxu1 %vm427_vm2, %v524_v39 }
 0x2b6   : > { %v829_v40 = vpop.f32.mrf.mxu1 }
 0x2b7   : > { %616 = vst.msk [vmem:[#allocation7 + $0x8] sm:$0xff] %vm614_vm3, %v829_v40 }
 0x2b8   : > { %v605_v41 = vpop.f32.mrf.mxu1 }
 0x2b9   : > { %615 = vst.msk [vmem:[#allocation7] sm:$0xff] %vm614_vm3, %v605_v41 }
 0x2ba PF: > { %p1096_p6 = scmp.eq.s32.totalorder %s717_s18, 1  ;;  %s969_s9 = smov [#allocation7]  }
 0x2bb   : > { %s626_s10 = sshll.u32 %s969_s9, 4  ;;  %s627_s10 = int_to_ptr.vmem [resolvable:$true] %s626_s10 }
 0x2bc   : > { %s910_s11 = scalar_lea.vmem %s627_s10, 256  ;;  %p917_p10 = scmp.lt.s32.totalorder %s627_s10, %s627_s10 }
 0x2bd   : > { %p911_p7 = scmp.ne.s32.totalorder %s627_s10, %s910_s11  ;;  %p918_p11 = scmp.lt.s32.totalorder %s910_s11, %s910_s11 }
 0x2bf   : > { %p912_p8 = pnand %p911_p7, %p1096_p6  ;;  %p919_p12 = por %p918_p11, %p917_p10 }
 0x2c1   : > { %p913_p9 = pneg %p912_p8 }
 0x2c3   : > { %p920_p13 = pnand %p919_p12, %p913_p9 }
 0x2c5   : > { %923 = shalt.err (!%p920_p13)
}
 0x2c6   : > { %s970_s12 = smov 128   ;;  %s971_s18 = smov 8  }
 0x2c7   : > { %835 = dma.vmem_to_hbm [thread:$0]  (%p1096_p6), %s627_s10, 256, %s1124_s4, [#allocation6], %s970_s12, %s970_s12, %s971_s18  }
 0x2c8   : > { %951 = dma.done.wait (%p1096_p6), [#allocation6], 256  }
 0x2c9   : > { %953 = vsyncadd (%p1096_p6), [#allocation6], 4294967040 }
 0x2ca PF: > { %s16_s17 = sadd.s32 1, %s964_s17   ;;  %s1128_s15 = smov %s960_s16 }
 0x2cb   : > { %p13_p0 = scmp.ge.s32.totalorder %s16_s17, 4   ;;  %s1129_s16 = smov %s1131_s19 }
 0x2cd   :  { %15 = sbr.rel (!%p13_p0) target bundleno = 3 (0x3), region = 84 }
 0x2d2   :  { %642 = vsyncpa [#allocation5], 1 }
 0x2d3   :  { %644 = vsyncpa [#allocation5 + $0x1], 1 }
 0x2d4   :  { %645 = vsyncpa [#allocation6], 1 }
 0x2d5   :  { %647 = vsyncpa [#allocation6 + $0x1], 1 }

</bundles_post_ra>
